<compile_context>
chip_gen: v7x
topology: tpu7x:2x2x1
jax: 0.10.0
libtpu: 0.0.40
codegen_flags: <defaults>
</compile_context>

<pallas_src>
import jax
import jax.numpy as jnp
from jax.experimental import pallas as pl
from jax.experimental.pallas import tpu as pltpu

FIRST_HIDDEN_LAYER = 100
SECOND_HIDDEN_LAYER = 50
OUTPUT_SIZE = 10
BN_EPS = 1e-5  # PyTorch BatchNorm1d default

LANE = 128
H1_PAD = 128    # FIRST_HIDDEN_LAYER  padded to lane multiple
H2_PAD = 128    # SECOND_HIDDEN_LAYER padded to lane multiple
OUT_PAD = 128   # OUTPUT_SIZE         padded to lane multiple
NEG_BIG = -1e30  # bias for padded logit lanes -> exp() underflows to exactly 0

# Rows of the packed [8, 128] vector slab.
_ROW_B0, _ROW_G1, _ROW_BE1, _ROW_B1, _ROW_G2, _ROW_BE2, _ROW_B2 = range(7)


def _round_up(n, m):
    return ((n + m - 1) // m) * m


def _thirdnet_kernel(x_ref, w0_ref, w12_ref, vecs_ref, out_ref):
    """x_ref:[B,Dp]  w0_ref:[Dp,128]  w12_ref:[256,128] (w1 rows 0:128, w2 rows 128:256)
    vecs_ref:[8,128] packed (b0,g1,be1,b1,g2,be2,b2,pad)  out_ref:[B,128]."""
    x = x_ref[...]
    vecs = vecs_ref[...]                      # one vreg; static row slices are cheap
    b0 = vecs[_ROW_B0:_ROW_B0 + 1, :]
    g1 = vecs[_ROW_G1:_ROW_G1 + 1, :]
    be1 = vecs[_ROW_BE1:_ROW_BE1 + 1, :]
    b1 = vecs[_ROW_B1:_ROW_B1 + 1, :]
    g2 = vecs[_ROW_G2:_ROW_G2 + 1, :]
    be2 = vecs[_ROW_BE2:_ROW_BE2 + 1, :]
    b2 = vecs[_ROW_B2:_ROW_B2 + 1, :]

    # ---- fc0 -> ReLU -> BatchNorm1d (batch stats, biased var, one-pass) ----
    h = jnp.dot(x, w0_ref[...], preferred_element_type=jnp.float32) + b0
    h = jnp.maximum(h, 0.0)
    mu = jnp.mean(h, axis=0, keepdims=True)
    var = jnp.maximum(jnp.mean(h * h, axis=0, keepdims=True) - mu * mu, 0.0)
    h = (h - mu) * (jax.lax.rsqrt(var + BN_EPS) * g1) + be1

    # ---- fc1 -> ReLU -> BatchNorm1d ----
    w1 = w12_ref[0:H1_PAD, :]
    h = jnp.dot(h, w1, preferred_element_type=jnp.float32) + b1
    h = jnp.maximum(h, 0.0)
    mu = jnp.mean(h, axis=0, keepdims=True)
    var = jnp.maximum(jnp.mean(h * h, axis=0, keepdims=True) - mu * mu, 0.0)
    h = (h - mu) * (jax.lax.rsqrt(var + BN_EPS) * g2) + be2

    # ---- fc2 -> log_softmax over the full 128 lanes ----
    # Padded logit lanes get bias NEG_BIG: they never win the max and exp() underflows
    # to 0 in the sum, so the real 10 logits are exact while stores stay lane-dense.
    w2 = w12_ref[H1_PAD:H1_PAD + H2_PAD, :]
    logits = jnp.dot(h, w2, preferred_element_type=jnp.float32) + b2
    m = jnp.max(logits, axis=1, keepdims=True)
    shifted = logits - m
    lse = jnp.log(jnp.sum(jnp.exp(shifted), axis=1, keepdims=True))
    out_ref[...] = shifted - lse


def thirdnet_forward(x_nchw, packed):
    """x_nchw: [B, C, H, W] float32.  packed: output of pack_params().
    Returns log-probabilities [B, OUTPUT_SIZE]."""
    B = x_nchw.shape[0]
    image_size = packed["image_size"]
    d_pad = packed["w0"].shape[0]
    x_flat = x_nchw.reshape(B, image_size)           # == torch x.view(-1, image_size)
    if d_pad != image_size:                          # zero-pad input features to lane multiple
        x_flat = jnp.pad(x_flat, ((0, 0), (0, d_pad - image_size)))

    vmem_full = pl.BlockSpec(memory_space=pltpu.MemorySpace.VMEM)  # full-array block in VMEM
    out_pad = pl.pallas_call(
        _thirdnet_kernel,
        out_shape=jax.ShapeDtypeStruct((B, OUT_PAD), jnp.float32),
        in_specs=[vmem_full, vmem_full, vmem_full, vmem_full],
        out_specs=vmem_full,
    )(x_flat, packed["w0"], packed["w12"], packed["vecs"])
    return out_pad[:, :OUTPUT_SIZE]


def init_params(key, image_size):
    """PyTorch-default init: Linear ~ U[-1/sqrt(fan_in), 1/sqrt(fan_in)], BN gamma=1, beta=0."""
    ks = jax.random.split(key, 6)

    def linear(kw, kb, fan_in, fan_out):
        bound = 1.0 / jnp.sqrt(jnp.float32(fan_in))
        w = jax.random.uniform(kw, (fan_in, fan_out), jnp.float32, -bound, bound)
        b = jax.random.uniform(kb, (fan_out,), jnp.float32, -bound, bound)
        return w, b

    w0, b0 = linear(ks[0], ks[1], image_size, FIRST_HIDDEN_LAYER)
    w1, b1 = linear(ks[2], ks[3], FIRST_HIDDEN_LAYER, SECOND_HIDDEN_LAYER)
    w2, b2 = linear(ks[4], ks[5], SECOND_HIDDEN_LAYER, OUTPUT_SIZE)
    return {
        "w0": w0, "b0": b0,
        "g1": jnp.ones((FIRST_HIDDEN_LAYER,), jnp.float32),
        "be1": jnp.zeros((FIRST_HIDDEN_LAYER,), jnp.float32),
        "w1": w1, "b1": b1,
        "g2": jnp.ones((SECOND_HIDDEN_LAYER,), jnp.float32),
        "be2": jnp.zeros((SECOND_HIDDEN_LAYER,), jnp.float32),
        "w2": w2, "b2": b2,
    }


def pack_params(params, image_size):
    """Zero-pad feature dims to 128 and pack into 3 kernel operands (done once, offline)."""
    d_pad = _round_up(image_size, LANE)

    w0p = jnp.zeros((d_pad, H1_PAD), jnp.float32).at[:image_size, :FIRST_HIDDEN_LAYER].set(params["w0"])
    w1p = jnp.zeros((H1_PAD, H2_PAD), jnp.float32).at[:FIRST_HIDDEN_LAYER, :SECOND_HIDDEN_LAYER].set(params["w1"])
    w2p = jnp.zeros((H2_PAD, OUT_PAD), jnp.float32).at[:SECOND_HIDDEN_LAYER, :OUTPUT_SIZE].set(params["w2"])
    w12 = jnp.concatenate([w1p, w2p], axis=0)        # [256, 128]

    vecs = jnp.zeros((8, LANE), jnp.float32)
    vecs = vecs.at[_ROW_B0, :FIRST_HIDDEN_LAYER].set(params["b0"])
    vecs = vecs.at[_ROW_G1, :FIRST_HIDDEN_LAYER].set(params["g1"])
    vecs = vecs.at[_ROW_BE1, :FIRST_HIDDEN_LAYER].set(params["be1"])
    vecs = vecs.at[_ROW_B1, :SECOND_HIDDEN_LAYER].set(params["b1"])
    vecs = vecs.at[_ROW_G2, :SECOND_HIDDEN_LAYER].set(params["g2"])
    vecs = vecs.at[_ROW_BE2, :SECOND_HIDDEN_LAYER].set(params["be2"])
    vecs = vecs.at[_ROW_B2, :].set(NEG_BIG)          # padded logit lanes -> effectively -inf
    vecs = vecs.at[_ROW_B2, :OUTPUT_SIZE].set(params["b2"])

    return {"w0": w0p, "w12": w12, "vecs": vecs, "image_size": image_size}


def thirdnet_reference(x_nchw, params, image_size):
    """Pure-JAX reference of the PyTorch forward (training-mode BN), unpadded."""
    x = x_nchw.reshape(x_nchw.shape[0], image_size)
    hp = jax.lax.Precision.HIGHEST

    def bn(h, g, be):
        mu = jnp.mean(h, axis=0, keepdims=True)
        var = jnp.mean((h - mu) ** 2, axis=0, keepdims=True)
        return (h - mu) * jax.lax.rsqrt(var + BN_EPS) * g + be

    h = jnp.maximum(jnp.dot(x, params["w0"], precision=hp) + params["b0"], 0.0)
    h = bn(h, params["g1"], params["be1"])
    h = jnp.maximum(jnp.dot(h, params["w1"], precision=hp) + params["b1"], 0.0)
    h = bn(h, params["g2"], params["be2"])
    logits = jnp.dot(h, params["w2"], precision=hp) + params["b2"]
    return jax.nn.log_softmax(logits, axis=1)


if __name__ == "__main__":
    key = jax.random.PRNGKey(0)
    k_x, k_p = jax.random.split(key)

    # Small NCHW input: batch=8 (one sublane), channels=1, 16x16 -> image_size=256.
    B, C, H, W = 8, 1, 16, 16
    image_size = C * H * W
    x = jax.random.normal(k_x, (B, C, H, W), jnp.float32)

    params = init_params(k_p, image_size)
    packed = pack_params(params, image_size)

    out = thirdnet_forward(x, packed)
    out = jax.block_until_ready(out)

    assert out.shape == (B, OUTPUT_SIZE)
    # log_softmax rows should exp-sum to ~1.
    row_sums = jnp.sum(jnp.exp(out), axis=1)
    assert bool(jnp.all(jnp.abs(row_sums - 1.0) < 1e-4))
    # Compare against the pure-JAX reference (generous tol for MXU f32 pass differences).
    ref = thirdnet_reference(x, params, image_size)
    assert bool(jnp.max(jnp.abs(out - ref)) < 5e-2)

    print("KERNEL_OK")
</pallas_src>

<mosaic_0001>
module attributes {stable_mosaic.version = 11 : i64} {
  func.func @_thirdnet_kernel(%arg0: memref<8x256xf32, #tpu.memory_space<vmem>>, %arg1: memref<256x128xf32, #tpu.memory_space<vmem>>, %arg2: memref<256x128xf32, #tpu.memory_space<vmem>>, %arg3: memref<8x128xf32, #tpu.memory_space<vmem>>, %arg4: memref<8x128xf32, #tpu.memory_space<vmem>>) attributes {dimension_semantics = [], scalar_prefetch = 0 : i64, scratch_operands = 0 : i64, tpu.core_type = #tpu.core_type<tc>} {
    %c0 = arith.constant 0 : index
    %c0_0 = arith.constant 0 : index
    %0 = vector.load %arg0[%c0, %c0_0] : memref<8x256xf32, #tpu.memory_space<vmem>>, vector<8x256xf32>
    %c0_1 = arith.constant 0 : index
    %c0_2 = arith.constant 0 : index
    %1 = vector.load %arg3[%c0_1, %c0_2] : memref<8x128xf32, #tpu.memory_space<vmem>>, vector<8x128xf32>
    %2 = vector.extract_strided_slice %1 {offsets = [0, 0], sizes = [1, 128], strides = [1, 1]} : vector<8x128xf32> to vector<1x128xf32>
    %3 = vector.extract_strided_slice %1 {offsets = [1, 0], sizes = [1, 128], strides = [1, 1]} : vector<8x128xf32> to vector<1x128xf32>
    %4 = vector.extract_strided_slice %1 {offsets = [2, 0], sizes = [1, 128], strides = [1, 1]} : vector<8x128xf32> to vector<1x128xf32>
    %5 = vector.extract_strided_slice %1 {offsets = [3, 0], sizes = [1, 128], strides = [1, 1]} : vector<8x128xf32> to vector<1x128xf32>
    %6 = vector.extract_strided_slice %1 {offsets = [4, 0], sizes = [1, 128], strides = [1, 1]} : vector<8x128xf32> to vector<1x128xf32>
    %7 = vector.extract_strided_slice %1 {offsets = [5, 0], sizes = [1, 128], strides = [1, 1]} : vector<8x128xf32> to vector<1x128xf32>
    %8 = vector.extract_strided_slice %1 {offsets = [6, 0], sizes = [1, 128], strides = [1, 1]} : vector<8x128xf32> to vector<1x128xf32>
    %c0_3 = arith.constant 0 : index
    %c0_4 = arith.constant 0 : index
    %9 = vector.load %arg1[%c0_3, %c0_4] : memref<256x128xf32, #tpu.memory_space<vmem>>, vector<256x128xf32>
    %cst = arith.constant dense<0.000000e+00> : vector<8x128xf32>
    %10 = tpu.matmul %0, %9, %cst {dimension_numbers = #tpu.dot_dimension_numbers<[1], [0], [0], [1], [0, 0, 1, 1], [], []>} : vector<8x256xf32>, vector<256x128xf32>, vector<8x128xf32> -> vector<8x128xf32>
    %11 = vector.broadcast %2 : vector<1x128xf32> to vector<8x128xf32>
    %12 = arith.addf %10, %11 : vector<8x128xf32>
    %cst_5 = arith.constant 0.000000e+00 : f32
    %13 = vector.broadcast %cst_5 : f32 to vector<8x128xf32>
    %14 = arith.maximumf %12, %13 : vector<8x128xf32>
    %cst_6 = arith.constant dense<0.000000e+00> : vector<128xf32>
    %15 = vector.multi_reduction <add>, %14, %cst_6 [0] : vector<8x128xf32> to vector<128xf32>
    %16 = vector.shape_cast %15 : vector<128xf32> to vector<1x128xf32>
    %cst_7 = arith.constant 8.000000e+00 : f32
    %17 = vector.broadcast %cst_7 : f32 to vector<1x128xf32>
    %18 = arith.divf %16, %17 : vector<1x128xf32>
    %19 = arith.mulf %14, %14 : vector<8x128xf32>
    %cst_8 = arith.constant dense<0.000000e+00> : vector<128xf32>
    %20 = vector.multi_reduction <add>, %19, %cst_8 [0] : vector<8x128xf32> to vector<128xf32>
    %21 = vector.shape_cast %20 : vector<128xf32> to vector<1x128xf32>
    %cst_9 = arith.constant 8.000000e+00 : f32
    %22 = vector.broadcast %cst_9 : f32 to vector<1x128xf32>
    %23 = arith.divf %21, %22 : vector<1x128xf32>
    %24 = arith.mulf %18, %18 : vector<1x128xf32>
    %25 = arith.subf %23, %24 : vector<1x128xf32>
    %cst_10 = arith.constant 0.000000e+00 : f32
    %26 = vector.broadcast %cst_10 : f32 to vector<1x128xf32>
    %27 = arith.maximumf %25, %26 : vector<1x128xf32>
    %28 = vector.broadcast %18 : vector<1x128xf32> to vector<8x128xf32>
    %29 = arith.subf %14, %28 : vector<8x128xf32>
    %cst_11 = arith.constant 9.99999974E-6 : f32
    %30 = vector.broadcast %cst_11 : f32 to vector<1x128xf32>
    %31 = arith.addf %27, %30 : vector<1x128xf32>
    %32 = math.rsqrt %31 : vector<1x128xf32>
    %33 = arith.mulf %32, %3 : vector<1x128xf32>
    %34 = vector.broadcast %33 : vector<1x128xf32> to vector<8x128xf32>
    %35 = arith.mulf %29, %34 : vector<8x128xf32>
    %36 = vector.broadcast %4 : vector<1x128xf32> to vector<8x128xf32>
    %37 = arith.addf %35, %36 : vector<8x128xf32>
    %c0_12 = arith.constant 0 : index
    %c0_13 = arith.constant 0 : index
    %38 = vector.load %arg2[%c0_12, %c0_13] : memref<256x128xf32, #tpu.memory_space<vmem>>, vector<128x128xf32>
    %cst_14 = arith.constant dense<0.000000e+00> : vector<8x128xf32>
    %39 = tpu.matmul %37, %38, %cst_14 {dimension_numbers = #tpu.dot_dimension_numbers<[1], [0], [0], [1], [0, 0, 1, 1], [], []>} : vector<8x128xf32>, vector<128x128xf32>, vector<8x128xf32> -> vector<8x128xf32>
    %40 = vector.broadcast %5 : vector<1x128xf32> to vector<8x128xf32>
    %41 = arith.addf %39, %40 : vector<8x128xf32>
    %cst_15 = arith.constant 0.000000e+00 : f32
    %42 = vector.broadcast %cst_15 : f32 to vector<8x128xf32>
    %43 = arith.maximumf %41, %42 : vector<8x128xf32>
    %cst_16 = arith.constant dense<0.000000e+00> : vector<128xf32>
    %44 = vector.multi_reduction <add>, %43, %cst_16 [0] : vector<8x128xf32> to vector<128xf32>
    %45 = vector.shape_cast %44 : vector<128xf32> to vector<1x128xf32>
    %cst_17 = arith.constant 8.000000e+00 : f32
    %46 = vector.broadcast %cst_17 : f32 to vector<1x128xf32>
    %47 = arith.divf %45, %46 : vector<1x128xf32>
    %48 = arith.mulf %43, %43 : vector<8x128xf32>
    %cst_18 = arith.constant dense<0.000000e+00> : vector<128xf32>
    %49 = vector.multi_reduction <add>, %48, %cst_18 [0] : vector<8x128xf32> to vector<128xf32>
    %50 = vector.shape_cast %49 : vector<128xf32> to vector<1x128xf32>
    %cst_19 = arith.constant 8.000000e+00 : f32
    %51 = vector.broadcast %cst_19 : f32 to vector<1x128xf32>
    %52 = arith.divf %50, %51 : vector<1x128xf32>
    %53 = arith.mulf %47, %47 : vector<1x128xf32>
    %54 = arith.subf %52, %53 : vector<1x128xf32>
    %cst_20 = arith.constant 0.000000e+00 : f32
    %55 = vector.broadcast %cst_20 : f32 to vector<1x128xf32>
    %56 = arith.maximumf %54, %55 : vector<1x128xf32>
    %57 = vector.broadcast %47 : vector<1x128xf32> to vector<8x128xf32>
    %58 = arith.subf %43, %57 : vector<8x128xf32>
    %cst_21 = arith.constant 9.99999974E-6 : f32
    %59 = vector.broadcast %cst_21 : f32 to vector<1x128xf32>
    %60 = arith.addf %56, %59 : vector<1x128xf32>
    %61 = math.rsqrt %60 : vector<1x128xf32>
    %62 = arith.mulf %61, %6 : vector<1x128xf32>
    %63 = vector.broadcast %62 : vector<1x128xf32> to vector<8x128xf32>
    %64 = arith.mulf %58, %63 : vector<8x128xf32>
    %65 = vector.broadcast %7 : vector<1x128xf32> to vector<8x128xf32>
    %66 = arith.addf %64, %65 : vector<8x128xf32>
    %c128 = arith.constant 128 : index
    %c0_22 = arith.constant 0 : index
    %67 = vector.load %arg2[%c128, %c0_22] : memref<256x128xf32, #tpu.memory_space<vmem>>, vector<128x128xf32>
    %cst_23 = arith.constant dense<0.000000e+00> : vector<8x128xf32>
    %68 = tpu.matmul %66, %67, %cst_23 {dimension_numbers = #tpu.dot_dimension_numbers<[1], [0], [0], [1], [0, 0, 1, 1], [], []>} : vector<8x128xf32>, vector<128x128xf32>, vector<8x128xf32> -> vector<8x128xf32>
    %69 = vector.broadcast %8 : vector<1x128xf32> to vector<8x128xf32>
    %70 = arith.addf %68, %69 : vector<8x128xf32>
    %cst_24 = arith.constant dense<0xFF800000> : vector<8xf32>
    %71 = vector.multi_reduction <maximumf>, %70, %cst_24 [1] : vector<8x128xf32> to vector<8xf32>
    %72 = vector.shape_cast %71 : vector<8xf32> to vector<8x1xf32>
    %73 = vector.broadcast %72 : vector<8x1xf32> to vector<8x128xf32>
    %74 = arith.subf %70, %73 : vector<8x128xf32>
    %75 = math.exp %74 : vector<8x128xf32>
    %cst_25 = arith.constant dense<0.000000e+00> : vector<8xf32>
    %76 = vector.multi_reduction <add>, %75, %cst_25 [1] : vector<8x128xf32> to vector<8xf32>
    %77 = vector.shape_cast %76 : vector<8xf32> to vector<8x1xf32>
    %78 = math.log %77 : vector<8x1xf32>
    %79 = vector.broadcast %78 : vector<8x1xf32> to vector<8x128xf32>
    %80 = arith.subf %74, %79 : vector<8x128xf32>
    %c0_26 = arith.constant 0 : index
    %c0_27 = arith.constant 0 : index
    %81 = vector.load %arg4[%c0_26, %c0_27] : memref<8x128xf32, #tpu.memory_space<vmem>>, vector<8x128xf32>
    tpu.vector_store %arg4[%c0_26, %c0_27], %80 {strides = array<i32>} : memref<8x128xf32, #tpu.memory_space<vmem>>, vector<8x128xf32>,
    return
  }
}

</mosaic_0001>

<bundles_post_ra>
// kernel: tpu_custom_call.1
= control target key start
LH: loop header
LB: loop body
LE: loop exit
PB: predicated region body
PF: predicated region fallthrough
CT: control target
= control target key end

     0   :  { %9 = vsyncpa [#allocation3], 0  ;;  %s895_s0 = inlined_call_operand.hbm [shape: f32[8,256], index: 0, kind: input, shape index: {}]   ;;  %s896_s1 = inlined_call_operand.hbm [shape: f32[256,128], index: 1, kind: input, shape index: {}]   ;;  %s897_s2 = inlined_call_operand.hbm [shape: f32[256,128], index: 2, kind: input, shape index: {}]   ;;  %s898_s3 = inlined_call_operand.vmem [shape: f32[8,128], index: 3, kind: input, shape index: {}]   ;;  %s899_s4 = inlined_call_operand.hbm [shape: f32[8,128], index: 4, kind: output, shape index: {}]  }
   0x1   :  { %10 = vsyncpa [#allocation6], 0 }
   0x2   :  { %11 = vsyncpa [#allocation4], 0  ;;  %s770_s15 = smov [#allocation5]   ;;  %s676_s19 = scalar_lea.hbm %s896_s1, 4096 }
   0x3   :  { %s27_s16 = sshll.u32 %s770_s15, 4  ;;  %p677_p0 = scmp.ne.s32.totalorder %s896_s1, %s676_s19  ;;  %s28_s16 = int_to_ptr.vmem [resolvable:$true] %s27_s16 }
   0x4   :  { %p680_p1 = scmp.lt.u32.totalorder %s676_s19, %s896_s1 }
   0x6   :  { %p682_p2 = pnand %p680_p1, %p677_p0 }
   0x8   :  { %685 = shalt.err (!%p682_p2)
}
   0x9   :  { %s686_s24 = scalar_lea.vmem %s28_s16, 4096  ;;  %p691_p4 = scmp.lt.s32.totalorder %s28_s16, %s28_s16 }
   0xa   :  { %p687_p3 = scmp.ne.s32.totalorder %s28_s16, %s686_s24  ;;  %p692_p5 = scmp.lt.s32.totalorder %s686_s24, %s686_s24 }
   0xc   :  { %p693_p6 = por %p692_p5, %p691_p4 }
   0xe   :  { %p694_p7 = pnand %p693_p6, %p687_p3 }
  0x10   :  { %697 = shalt.err (!%p694_p7)
}
  0x11   :  { %s771_s25 = smov 128   ;;  %s772_s26 = smov 8  }
  0x12   :  { %33 = dma.hbm_to_vmem [thread:$0]  %s896_s1, 4096, %s28_s16, [#allocation6], %s771_s25, %s771_s25, %s772_s26  }
  0x13   :  { %s773_s29 = smov [#allocation2]   ;;  %s774_s5 = smov [#allocation7]  }
  0x14   :  { %s18_s30 = sshll.u32 %s773_s29, 4  ;;  %s39_s6 = sshll.u32 %s774_s5, 4  ;;  %s19_s30 = int_to_ptr.vmem [resolvable:$true] %s18_s30  ;;  %s40_s6 = int_to_ptr.vmem [resolvable:$true] %s39_s6 }
  0x15   :  { %s698_s9 = scalar_lea.hbm %s895_s0, 256 }
  0x16   :  { %p699_p8 = scmp.ne.s32.totalorder %s895_s0, %s698_s9  ;;  %p702_p9 = scmp.lt.u32.totalorder %s698_s9, %s895_s0 }
  0x18   :  { %p704_p10 = pnand %p702_p9, %p699_p8 }
  0x1a   :  { %707 = shalt.err (!%p704_p10)
}
  0x1b   :  { %s708_s1 = scalar_lea.vmem %s19_s30, 256  ;;  %p713_p12 = scmp.lt.s32.totalorder %s19_s30, %s19_s30 }
  0x1c   :  { %p709_p11 = scmp.ne.s32.totalorder %s19_s30, %s708_s1  ;;  %p714_p13 = scmp.lt.s32.totalorder %s708_s1, %s708_s1 }
  0x1e   :  { %p715_p0 = por %p714_p13, %p713_p12 }
  0x20   :  { %p716_p1 = pnand %p715_p0, %p709_p11 }
  0x22   :  { %719 = shalt.err (!%p716_p1)
}
  0x23   :  { %21 = dma.hbm_to_vmem [thread:$0]  %s895_s0, 256, %s19_s30, [#allocation3]  }
  0x24   :  { %s720_s18 = scalar_lea.hbm %s897_s2, 4096 }
  0x25   :  { %p721_p2 = scmp.ne.s32.totalorder %s897_s2, %s720_s18  ;;  %p724_p3 = scmp.lt.u32.totalorder %s720_s18, %s897_s2 }
  0x27   :  { %p726_p4 = pnand %p724_p3, %p721_p2 }
  0x29   :  { %729 = shalt.err (!%p726_p4)
}
  0x2a   :  { %s730_s23 = scalar_lea.vmem %s40_s6, 4096  ;;  %p735_p6 = scmp.lt.s32.totalorder %s40_s6, %s40_s6 }
  0x2b   :  { %p731_p5 = scmp.ne.s32.totalorder %s40_s6, %s730_s23  ;;  %p736_p7 = scmp.lt.s32.totalorder %s730_s23, %s730_s23 }
  0x2d   :  { %p737_p8 = por %p736_p7, %p735_p6 }
  0x2f   :  { %p738_p9 = pnand %p737_p8, %p731_p5 }
  0x31   :  { %741 = shalt.err (!%p738_p9)
}
  0x32   :  { %45 = dma.hbm_to_vmem [thread:$0]  %s897_s2, 4096, %s40_s6, [#allocation6], %s771_s25, %s771_s25, %s772_s26  }
  0x33   :  { %764 = dma.done.wait [#allocation3], 256  }
  0x34   :  { %765 = vsyncadd [#allocation3], 4294967040 }
  0x35   :  { %766 = dma.done.wait [#allocation6], 8192  }
  0x36   :  { %767 = vsyncadd [#allocation6], 4294959104  ;;  %v76_v0 = vld [vmem:[#allocation5 + $0x80] sm:$0xff]  ;;  %v77_v1 = vld [vmem:[#allocation5 + $0x88] sm:$0xff]  ;;  %v775_v53 = vmov 0.0|0.0   ;;  %vm776_vm0 = vmmov 0  }
  0x37   :  { %v60_v2 = vld [vmem:[#allocation5] sm:$0xff]  ;;  %v579_v3 = vpack.c.bf16 %v77_v1, %v76_v0  ;;  %v61_v4 = vld [vmem:[#allocation5 + $0x8] sm:$0xff]  ;;  %v78_v5 = vld [vmem:[#allocation5 + $0x90] sm:$0xff]  ;;  %611 = vmatprep.subr.bf16.mxu1 %v775_v53  ;;  %v777_v59 = vmov 0.0  }
  0x38   :  { %v79_v6 = vld [vmem:[#allocation5 + $0x98] sm:$0xff]  ;;  %v581_v7 = vpack.c.bf16 %v61_v4, %v60_v2  ;;  %v62_v9 = vld [vmem:[#allocation5 + $0x10] sm:$0xff]  ;;  %v80_v11 = vld [vmem:[#allocation5 + $0xa0] sm:$0xff]  ;;  %541 = vmatprep.mubr.msk.f32.mxu1 %vm776_vm0, %v777_v59 }
  0x39   :  { %v583_v8 = vpack.c.bf16 %v79_v6, %v78_v5  ;;  %v63_v10 = vld [vmem:[#allocation5 + $0x18] sm:$0xff]  ;;  %580 = vmatprep.subr.bf16.mxu0 %v579_v3  ;;  %v81_v12 = vld [vmem:[#allocation5 + $0xa8] sm:$0xff]  ;;  %v64_v15 = vld [vmem:[#allocation5 + $0x20] sm:$0xff] }
  0x3a   :  { %582 = vmatpush3.bf16.msra.mxu0 %v581_v7  ;;  %v585_v13 = vpack.c.bf16 %v63_v10, %v62_v9  ;;  %v587_v14 = vpack.c.bf16 %v81_v12, %v80_v11  ;;  %v65_v16 = vld [vmem:[#allocation5 + $0x28] sm:$0xff]  ;;  %v82_v17 = vld [vmem:[#allocation5 + $0xb0] sm:$0xff]  ;;  %v83_v18 = vld [vmem:[#allocation5 + $0xb8] sm:$0xff]  ;;  %v92_v12 = vlaneseq }
  0x3b   :  { %584 = vmatprep.subr.bf16.mxu0 %v583_v8  ;;  %v589_v19 = vpack.c.bf16 %v65_v16, %v64_v15  ;;  %v591_v20 = vpack.c.bf16 %v83_v18, %v82_v17  ;;  %v66_v21 = vld [vmem:[#allocation5 + $0x30] sm:$0xff]  ;;  %v67_v22 = vld [vmem:[#allocation5 + $0x38] sm:$0xff]  ;;  %v84_v23 = vld [vmem:[#allocation5 + $0xc0] sm:$0xff] }
  0x3c   :  { %v85_v24 = vld [vmem:[#allocation5 + $0xc8] sm:$0xff]  ;;  %v58_v25 = vld [vmem:[#allocation2 + $0x8] sm:$0xff]  ;;  %v593_v26 = vpack.c.bf16 %v67_v22, %v66_v21  ;;  %v68_v28 = vld [vmem:[#allocation5 + $0x40] sm:$0xff] }
  0x3d   :  { %160 = vmatprep.mubr.f32.mxu0 %v58_v25  ;;  %v595_v27 = vpack.c.bf16 %v85_v24, %v84_v23  ;;  %v69_v29 = vld [vmem:[#allocation5 + $0x48] sm:$0xff]  ;;  %v86_v30 = vld [vmem:[#allocation5 + $0xd0] sm:$0xff]  ;;  %v87_v31 = vld [vmem:[#allocation5 + $0xd8] sm:$0xff] }
  0x3e   :  { %586 = vmatpush3.bf16.msra.mxu0 %v585_v13  ;;  %v597_v32 = vpack.c.bf16 %v69_v29, %v68_v28  ;;  %v599_v33 = vpack.c.bf16 %v87_v31, %v86_v30  ;;  %v70_v34 = vld [vmem:[#allocation5 + $0x50] sm:$0xff]  ;;  %v71_v35 = vld [vmem:[#allocation5 + $0x58] sm:$0xff]  ;;  %v88_v36 = vld [vmem:[#allocation5 + $0xe0] sm:$0xff]  ;;  %v855_v13 = vshrl.u32 %v92_v12, 7 }
  0x3f   :  { %588 = vmatprep.subr.bf16.mxu0 %v587_v14  ;;  %v89_v37 = vld [vmem:[#allocation5 + $0xe8] sm:$0xff]  ;;  %v601_v38 = vpack.c.bf16 %v71_v35, %v70_v34  ;;  %v72_v40 = vld [vmem:[#allocation5 + $0x60] sm:$0xff]  ;;  %v90_v42 = vld [vmem:[#allocation5 + $0xf0] sm:$0xff] }
  0x40   :  { %v603_v39 = vpack.c.bf16 %v89_v37, %v88_v36  ;;  %v73_v41 = vld [vmem:[#allocation5 + $0x68] sm:$0xff]  ;;  %v91_v43 = vld [vmem:[#allocation5 + $0xf8] sm:$0xff]  ;;  %v74_v46 = vld [vmem:[#allocation5 + $0x70] sm:$0xff]  ;;  %v94_v14 = vsub.s32 0, %v855_v13 }
  0x41   :  { %v605_v44 = vpack.c.bf16 %v73_v41, %v72_v40  ;;  %v607_v45 = vpack.c.bf16 %v91_v43, %v90_v42  ;;  %v75_v47 = vld [vmem:[#allocation5 + $0x78] sm:$0xff]  ;;  %v57_v49 = vld [vmem:[#allocation2] sm:$0xff]  ;;  %v200_v50 = vld [vmem:[#allocation7] sm:$0xff]  ;;  %v192_v41 = vsub.s32 1, %v855_v13  ;;  %v197_v42 = vsub.s32 2, %v855_v13 }
  0x42   :  { %590 = vmatpush3.bf16.msra.mxu0 %v589_v19  ;;  %v609_v48 = vpack.c.bf16 %v75_v47, %v74_v46  ;;  %v201_v51 = vld [vmem:[#allocation7 + $0x8] sm:$0xff]  ;;  %v202_v54 = vld [vmem:[#allocation7 + $0x10] sm:$0xff]  ;;  %v203_v55 = vld [vmem:[#allocation7 + $0x18] sm:$0xff] }
  0x43   :  { %592 = vmatprep.subr.bf16.mxu0 %v591_v20  ;;  %v612_v52 = vpack.c.bf16 %v201_v51, %v200_v50  ;;  %v615_v56 = vpack.c.bf16 %v203_v55, %v202_v54  ;;  %v204_v57 = vld [vmem:[#allocation7 + $0x20] sm:$0xff]  ;;  %v205_v58 = vld [vmem:[#allocation7 + $0x28] sm:$0xff]  ;;  %v206_v61 = vld [vmem:[#allocation7 + $0x30] sm:$0xff] }
  0x44   :  { %v618_v60 = vpack.c.bf16 %v205_v58, %v204_v57  ;;  %v207_v62 = vld [vmem:[#allocation7 + $0x38] sm:$0xff]  ;;  %v208_v0 = vld [vmem:[#allocation7 + $0x40] sm:$0xff]  ;;  %v209_v1 = vld [vmem:[#allocation7 + $0x48] sm:$0xff] }
  0x45   :  { %613 = vmatpush3.bf16.msra.mxu1 %v612_v52  ;;  %v621_v63 = vpack.c.bf16 %v207_v62, %v206_v61  ;;  %v624_v2 = vpack.c.bf16 %v209_v1, %v208_v0  ;;  %v210_v3 = vld [vmem:[#allocation7 + $0x50] sm:$0xff]  ;;  %v211_v4 = vld [vmem:[#allocation7 + $0x58] sm:$0xff]  ;;  %v212_v6 = vld [vmem:[#allocation7 + $0x60] sm:$0xff] }
  0x46   :  { %594 = vmatpush3.bf16.msra.mxu0 %v593_v26  ;;  %614 = vmatprep.subr.bf16.mxu1 %v775_v53  ;;  %v627_v5 = vpack.c.bf16 %v211_v4, %v210_v3  ;;  %v213_v7 = vld [vmem:[#allocation7 + $0x68] sm:$0xff]  ;;  %v214_v9 = vld [vmem:[#allocation7 + $0x70] sm:$0xff]  ;;  %v215_v10 = vld [vmem:[#allocation7 + $0x78] sm:$0xff] }
  0x47   :  { %596 = vmatprep.subr.bf16.mxu0 %v595_v27  ;;  %v630_v8 = vpack.c.bf16 %v213_v7, %v212_v6  ;;  %v633_v11 = vpack.c.bf16 %v215_v10, %v214_v9  ;;  %v861_v15 = vld [vmem:[%s898_s3] sm:$0xff]  ;;  %v323_v50 = vld [vmem:[#allocation7 + $0x80] sm:$0xff]  ;;  %v324_v51 = vld [vmem:[#allocation7 + $0x88] sm:$0xff]  ;;  %s778_s3 = smov [#allocation8]  }
  0x48   :  { %v95_v17 = vrot.slane %v861_v15, %v94_v14  ;;  %v198_v47 = vrot.slane %v861_v15, %v197_v42  ;;  %v636_v52 = vpack.c.bf16 %v324_v51, %v323_v50  ;;  %v325_v54 = vld [vmem:[#allocation7 + $0x90] sm:$0xff]  ;;  %v326_v55 = vld [vmem:[#allocation7 + $0x98] sm:$0xff]  ;;  %v327_v57 = vld [vmem:[#allocation7 + $0xa0] sm:$0xff]  ;;  %s430_s26 = sshll.u32 %s778_s3, 4  ;;  %s431_s26 = int_to_ptr.vmem [resolvable:$true] %s430_s26 }
  0x49   :  { %616 = vmatpush3.bf16.msra.mxu1 %v615_v56  ;;  %v639_v56 = vpack.c.bf16 %v326_v55, %v325_v54  ;;  %v328_v58 = vld [vmem:[#allocation7 + $0xa8] sm:$0xff]  ;;  %v330_v61 = vld [vmem:[#allocation7 + $0xb8] sm:$0xff]  ;;  %s742_s27 = scalar_lea.vmem %s431_s26, 128  ;;  %p747_p11 = scmp.lt.s32.totalorder %s431_s26, %s431_s26 }
  0x4a   :  { %598 = vmatpush3.bf16.msra.mxu0 %v597_v32  ;;  %617 = vmatprep.subr.bf16.mxu1 %v775_v53  ;;  %v332_v0 = vld [vmem:[#allocation7 + $0xc8] sm:$0xff]  ;;  %v334_v3 = vld [vmem:[#allocation7 + $0xd8] sm:$0xff]  ;;  %p743_p10 = scmp.ne.s32.totalorder %s431_s26, %s742_s27  ;;  %p748_p12 = scmp.lt.s32.totalorder %s742_s27, %s742_s27 }
  0x4b   :  { %600 = vmatprep.subr.bf16.mxu0 %v599_v33  ;;  %v336_v6 = vld [vmem:[#allocation7 + $0xe8] sm:$0xff]  ;;  %v338_v9 = vld [vmem:[#allocation7 + $0xf8] sm:$0xff] }
  0x4c   :  { %p749_p13 = por %p748_p12, %p747_p11 }
  0x4d   :  { %619 = vmatpush3.bf16.msra.mxu1 %v618_v60  ;;  %v329_v60 = vld [vmem:[#allocation7 + $0xb0] sm:$0xff] }
  0x4e   :  { %602 = vmatpush3.bf16.msra.mxu0 %v601_v38  ;;  %620 = vmatprep.subr.bf16.mxu1 %v775_v53  ;;  %v645_v62 = vpack.c.bf16 %v330_v61, %v329_v60  ;;  %p750_p0 = pnand %p749_p13, %p743_p10 }
  0x4f   :  { %604 = vmatprep.subr.bf16.mxu0 %v603_v39 }
  0x51   :  { %622 = vmatpush3.bf16.msra.mxu1 %v621_v63  ;;  %v331_v63 = vld [vmem:[#allocation7 + $0xc0] sm:$0xff] }
  0x52   :  { %606 = vmatpush3.bf16.msra.mxu0 %v605_v44  ;;  %623 = vmatprep.subr.bf16.mxu1 %v775_v53  ;;  %v648_v1 = vpack.c.bf16 %v332_v0, %v331_v63 }
  0x53   :  { %608 = vmatprep.subr.bf16.mxu0 %v607_v45 }
  0x55   :  { %625 = vmatpush3.bf16.msra.mxu1 %v624_v2  ;;  %v333_v2 = vld [vmem:[#allocation7 + $0xd0] sm:$0xff] }
  0x56   :  { %610 = vmatpush3.bf16.msra.mxu0 %v609_v48  ;;  %626 = vmatprep.subr.bf16.mxu1 %v775_v53  ;;  %v651_v4 = vpack.c.bf16 %v334_v3, %v333_v2 }
  0x57   :  { %635 = vmatprep.subr.bf16.mxu0 %v775_v53 }
  0x59   :  { %161 = vmatmul.mubr.f32.vlgmr.msra.gmra.mrb[0].mxu0 %v57_v49  ;;  %628 = vmatpush3.bf16.msra.mxu1 %v627_v5  ;;  %v335_v5 = vld [vmem:[#allocation7 + $0xe0] sm:$0xff] }
  0x5a   :  { %576 = vmatprep.mubr.msk.f32.mxu0 %vm776_vm0, %v777_v59  ;;  %629 = vmatprep.subr.bf16.mxu1 %v775_v53  ;;  %v642_v59 = vpack.c.bf16 %v328_v58, %v327_v57  ;;  %v654_v7 = vpack.c.bf16 %v336_v6, %v335_v5 }
  0x5b   :  { %637 = vmatpush3.bf16.msra.mxu0 %v636_v52 }
  0x5c   :  { %638 = vmatprep.subr.bf16.mxu0 %v775_v53 }
  0x5d   :  { %631 = vmatpush3.bf16.msra.mxu1 %v630_v8  ;;  %v337_v8 = vld [vmem:[#allocation7 + $0xf0] sm:$0xff] }
  0x5e   :  { %632 = vmatprep.subr.bf16.mxu1 %v775_v53  ;;  %v657_v10 = vpack.c.bf16 %v338_v9, %v337_v8 }
  0x5f   :  { %640 = vmatpush3.bf16.msra.mxu0 %v639_v56 }
  0x60   :  { %641 = vmatprep.subr.bf16.mxu0 %v775_v53 }
  0x61   :  { %634 = vmatpush3.bf16.msra.mxu1 %v633_v11  ;;  %v218_v11 = vsub.s32 3, %v855_v13 }
  0x63   :  { %643 = vmatpush3.bf16.msra.mxu0 %v642_v59  ;;  %v219_v12 = vrot.slane %v861_v15, %v218_v11 }
  0x64   :  { %644 = vmatprep.subr.bf16.mxu0 %v775_v53 }
  0x67   :  { %646 = vmatpush3.bf16.msra.mxu0 %v645_v62 }
  0x68   :  { %647 = vmatprep.subr.bf16.mxu0 %v775_v53 }
  0x6b   :  { %649 = vmatpush3.bf16.msra.mxu0 %v648_v1 }
  0x6c   :  { %650 = vmatprep.subr.bf16.mxu0 %v775_v53 }
  0x6f   :  { %652 = vmatpush3.bf16.msra.mxu0 %v651_v4 }
  0x70   :  { %653 = vmatprep.subr.bf16.mxu0 %v775_v53 }
  0x73   :  { %655 = vmatpush3.bf16.msra.mxu0 %v654_v7 }
  0x74   :  { %656 = vmatprep.subr.bf16.mxu0 %v775_v53 }
  0x77   :  { %658 = vmatpush3.bf16.msra.mxu0 %v657_v10 }
 0x12c   :  { %v472_v16 = vpop.f32.mrb[0].mxu0 }
 0x12d   :  { %v473_v18 = vpop.f32.mrb[1].mxu0 }
 0x12e   :  { %v474_v19 = vadd.f32 %v473_v18, %v472_v16 }
 0x130   :  { %v163_v20 = vadd.f32 %v474_v19, %v95_v17 }
 0x132   :  { %v166_v21 = vmax.f32 %v163_v20, 0.0 }
 0x134   :  { %v167_v22 = vrot.slane %v166_v21, 4  ;;  %v175_v23 = vmul.f32 %v166_v21, %v166_v21 }
 0x136   :  { %v168_v24 = vadd.f32 %v167_v22, %v166_v21  ;;  %v176_v25 = vrot.slane %v175_v23, 4 }
 0x138   :  { %v169_v26 = vrot.slane %v168_v24, 2  ;;  %v177_v27 = vadd.f32 %v176_v25, %v175_v23 }
 0x13a   :  { %v178_v28 = vrot.slane %v177_v27, 2  ;;  %v170_v29 = vadd.f32 %v169_v26, %v168_v24 }
 0x13c   :  { %v179_v30 = vadd.f32 %v178_v28, %v177_v27  ;;  %v171_v31 = vrot.slane %v170_v29, 1 }
 0x13e   :  { %v180_v32 = vrot.slane %v179_v30, 1  ;;  %v172_v33 = vadd.f32 %v171_v31, %v170_v29 }
 0x140   :  { %v174_v34 = vmul.f32 0.125, %v172_v33  ;;  %v181_v35 = vadd.f32 %v180_v32, %v179_v30 }
 0x142   :  { %v182_v36 = vmul.f32 0.125, %v181_v35  ;;  %v183_v37 = vmul.f32 %v174_v34, %v174_v34  ;;  %v186_v45 = vsub.f32 %v166_v21, %v174_v34 }
 0x144   :  { %v184_v38 = vsub.f32 %v182_v36, %v183_v37  ;;  %v315_v37 = vsub.s32 4, %v855_v13 }
 0x146   :  { %v185_v39 = vmax.f32 %v184_v38, 0.0  ;;  %v320_v38 = vsub.s32 5, %v855_v13 }
 0x148   :  { %v187_v40 = vadd.f32 1e-05, %v185_v39 }
 0x14a   :  { %668 = vrsqrt.f32 %v187_v40 }
 0x154   :  { %v669_v43 = vpop.eup %668 }
 0x155   :  { %v189_v44 = vmul.f32 %v669_v43, %v861_v15  ;;  %v321_v43 = vrot.slane %v861_v15, %v320_v38 }
 0x157   :  { %v193_v46 = vrot.slane %v189_v44, %v192_v41 }
 0x159   :  { %v194_v48 = vmul.f32 %v193_v46, %v186_v45  ;;  %v341_v46 = vsub.s32 6, %v855_v13 }
 0x15b   :  { %v199_v49 = vadd.f32 %v198_v47, %v194_v48  ;;  %v342_v47 = vrot.slane %v861_v15, %v341_v46 }
 0x15d   :  { %542 = vmatmul.mubr.f32.vlgmr.msra.gmra.mrb[0].mxu1 %v199_v49 }
 0x230   :  { %v286_v14 = vpop.f32.mrb[0].mxu1 }
 0x231   :  { %v287_v16 = vadd.f32 %v286_v14, %v219_v12  ;;  %v543_v17 = vpop.f32.mrb[1].mxu1 }
 0x233   :  { %v290_v18 = vmax.f32 %v287_v16, 0.0 }
 0x235   :  { %v291_v19 = vrot.slane %v290_v18, 4  ;;  %v298_v20 = vmul.f32 %v290_v18, %v290_v18 }
 0x237   :  { %v292_v21 = vadd.f32 %v291_v19, %v290_v18  ;;  %v299_v22 = vrot.slane %v298_v20, 4 }
 0x239   :  { %v293_v23 = vrot.slane %v292_v21, 2  ;;  %v300_v24 = vadd.f32 %v299_v22, %v298_v20 }
 0x23b   :  { %v294_v25 = vadd.f32 %v293_v23, %v292_v21  ;;  %v301_v26 = vrot.slane %v300_v24, 2 }
 0x23d   :  { %v295_v27 = vrot.slane %v294_v25, 1  ;;  %v302_v28 = vadd.f32 %v301_v26, %v300_v24 }
 0x23f   :  { %v296_v53 = vadd.f32 %v295_v27, %v294_v25  ;;  %v303_v29 = vrot.slane %v302_v28, 1 }
 0x241   :  { %v297_v30 = vmul.f32 0.125, %v296_v53  ;;  %v304_v31 = vadd.f32 %v303_v29, %v302_v28 }
 0x243   :  { %v305_v32 = vmul.f32 0.125, %v304_v31  ;;  %v306_v33 = vmul.f32 %v297_v30, %v297_v30  ;;  %v309_v41 = vsub.f32 %v290_v18, %v297_v30 }
 0x245   :  { %v307_v34 = vsub.f32 %v305_v32, %v306_v33 }
 0x247   :  { %v308_v35 = vmax.f32 %v307_v34, 0.0 }
 0x249   :  { %v310_v36 = vadd.f32 1e-05, %v308_v35 }
 0x24b   :  { %670 = vrsqrt.f32 %v310_v36 }
 0x255   :  { %v671_v39 = vpop.eup %670 }
 0x256   :  { %v312_v40 = vmul.f32 %v671_v39, %v861_v15 }
 0x258   :  { %v316_v42 = vrot.slane %v312_v40, %v315_v37 }
 0x25a   :  { %v317_v44 = vmul.f32 %v316_v42, %v309_v41 }
 0x25c   :  { %v322_v45 = vadd.f32 %v321_v43, %v317_v44 }
 0x25e   :  { %577 = vmatmul.mubr.f32.vlgmr.msra.gmra.mrb[2].mxu0 %v322_v45 }
 0x331   :  { %v409_v48 = vpop.f32.mrb[2].mxu0 }
 0x332   :  { %v410_v49 = vadd.f32 %v409_v48, %v342_v47  ;;  %v578_v50 = vpop.f32.mrb[3].mxu0 }
 0x334   :  { %413 = vmax.xlane.f32.xlu0 %v410_v49 }
 0x3c1   :  { %v414_v51 = vpop.xlane.xlu0 %413 }
 0x3c2   :  { %v415_v52 = vsub.f32 %v410_v49, %v414_v51 }
 0x3c4   :  { %v416_v54 = vmul.f32 1.442695, %v415_v52 }
 0x3c6   :  { %672 = vpow2.f32 %v416_v54 }
 0x3d0   :  { %v673_v55 = vpop.eup %672 }
 0x3d1   :  { %418 = vadd.xlane.f32.xlu0 %v673_v55 }
 0x45e   :  { %v419_v56 = vpop.xlane.xlu0 %418 }
 0x45f   :  { %674 = vlog2.f32 %v419_v56 }
 0x469   :  { %v675_v57 = vpop.eup %674 }
 0x46a   :  { %v421_v58 = vmul.f32 0.6931472, %v675_v57 }
 0x46c   :  { %v422_v59 = vsub.f32 %v415_v52, %v421_v58 }
 0x46e   :  { %423 = vst [vmem:[#allocation8] sm:$0xff] %v422_v59 }
 0x46f   :  { %753 = shalt.err (!%p750_p0)
}
 0x470   :  { %s754_s30 = scalar_lea.hbm %s899_s4, 128 }
 0x471   :  { %p755_p1 = scmp.ne.s32.totalorder %s899_s4, %s754_s30  ;;  %p758_p2 = scmp.lt.u32.totalorder %s754_s30, %s899_s4 }
 0x473   :  { %p760_p3 = pnand %p758_p2, %p755_p1 }
 0x475   :  { %763 = shalt.err (!%p760_p3)
}
 0x476   :  { %433 = dma.vmem_to_hbm [thread:$0]  %s431_s26, 128, %s899_s4, [#allocation4]  }
 0x477   :  { %768 = dma.done.wait [#allocation4], 128  }
 0x478   :  { %769 = vsyncadd [#allocation4], 4294967168 }
 0x479   :  { %437 = vsyncpa [#allocation3], 1 }
 0x47a   :  { %438 = vsyncpa [#allocation6], 1 }
 0x47b   :  { %439 = vsyncpa [#allocation4], 1 }

</bundles_post_ra>
